<compile_context>
chip_gen: v7x
topology: tpu7x:2x2x1
jax: 0.10.0
libtpu: 0.0.40
codegen_flags: <defaults>
</compile_context>

<pallas_src>
import math
from functools import partial

import jax
import jax.numpy as jnp
from jax import lax
from jax.experimental import pallas as pl
from jax.experimental.pallas import tpu as pltpu


def _round_up(x, m):
    return (x + m - 1) // m * m


_NORM_VMEM_LIMIT = 48 * 1024 * 1024   # safe on v5e/v6e (128 MiB) and v7x (64 MiB)


# ----------------------------------------------------------------------------
# Pallas kernel 1: MXU matmul, bf16 inputs / f32 accumulation, fused bias+act
# ----------------------------------------------------------------------------
def _matmul_kernel(a_ref, b_ref, bias_ref, o_ref, *, act):
    acc = jnp.dot(a_ref[...], b_ref[...], preferred_element_type=jnp.float32)
    acc = acc + bias_ref[...]
    if act == "gelu":
        acc = jax.nn.gelu(acc)
    o_ref[...] = acc.astype(o_ref.dtype)


def _pick_tm(M, K):
    # ~2 MB bf16 A tile, power of two, capped at 2048 rows.
    target = (2 * 1024 * 1024) // max(2 * K, 1)
    tm = 8
    while tm * 2 <= min(target, 2048):
        tm *= 2
    return min(tm, _round_up(M, 8))


def matmul(a, b, bias=None, act=None):
    """(M,K) @ (K,N) + bias (optionally GELU).  bf16 MXU inputs, f32 output.

    Full-K and full-N blocks (exempt from the (8,128) rule) so no zero-padded
    A/B copies or output-slice round-trips; only M is tiled (and padded only
    when M is tiny)."""
    M, K = a.shape
    K2, N = b.shape
    assert K == K2
    a = a.astype(jnp.bfloat16)
    b = b.astype(jnp.bfloat16)
    if bias is None:
        bias = jnp.zeros((N,), jnp.float32)
    bias = bias.astype(jnp.float32).reshape(1, N)

    Np = N if N >= 8 else 8
    if Np != N:
        b = jnp.pad(b, ((0, 0), (0, Np - N)))
        bias = jnp.pad(bias, ((0, 0), (0, Np - N)))

    tm = _pick_tm(M, K)
    Mp = _round_up(M, tm)
    if Mp != M:
        a = jnp.pad(a, ((0, Mp - M), (0, 0)))

    out = pl.pallas_call(
        partial(_matmul_kernel, act=act),
        out_shape=jax.ShapeDtypeStruct((Mp, Np), jnp.float32),
        grid=(Mp // tm,),
        in_specs=[pl.BlockSpec((tm, K), lambda i: (i, 0)),
                  pl.BlockSpec((K, Np), lambda i: (0, 0)),
                  pl.BlockSpec((1, Np), lambda i: (0, 0))],
        out_specs=pl.BlockSpec((tm, Np), lambda i: (i, 0)),
        compiler_params=pltpu.CompilerParams(
            dimension_semantics=("parallel",)),
    )(a, b, bias)
    if Mp != M or Np != N:
        out = out[:M, :N]
    return out


def linear(x2d, w, b, act=None):
    return matmul(x2d, w, b, act=act)


# ----------------------------------------------------------------------------
# Pallas kernels 2/3: fused InstanceNorm (channels-last, no HBM transposes)
#
# The NDHWC tensor (B, S, C) is viewed as (B, S/pack, pack*C) (a free
# row-major reshape) so the lane dimension is dense even for small C.  Lane r
# holds channel r % C; per-channel sums are recovered with a tiny
# (1, pack*C) @ (pack*C, pack*C) group-sum matmul which also broadcasts the
# statistics back to the packed lane layout.
# ----------------------------------------------------------------------------
def _choose_pack(S, C):
    for p in (8, 4, 2):
        if S % p == 0 and C * p <= 512:
            return p
    return 1


def _pack_channels(x, pack):
    B, D, H, W, C = x.shape
    S = D * H * W
    return x.reshape(B, S // pack, pack * C)


def _group_matrix(C, pack):
    pc = pack * C
    idx = jnp.arange(pc) % C
    return (idx[:, None] == idx[None, :]).astype(jnp.float32)


def _norm_stats(x, p, inv_n):
    s1 = jnp.sum(x, axis=0, keepdims=True)          # (1, PC)
    s2 = jnp.sum(x * x, axis=0, keepdims=True)      # (1, PC)
    s1 = jnp.dot(s1, p, preferred_element_type=jnp.float32)
    s2 = jnp.dot(s2, p, preferred_element_type=jnp.float32)
    mean = s1 * inv_n
    var = s2 * inv_n - mean * mean
    return mean, var


def _norm_act_bias_kernel(x_ref, g_ref, b_ref, p_ref, cb_ref, o_ref, *,
                          inv_n, eps, neg_slope):
    x = x_ref[...]
    mean, var = _norm_stats(x, p_ref[...], inv_n)
    scale = g_ref[...] * lax.rsqrt(var + eps)
    y = (x - mean) * scale + b_ref[...]
    y = jnp.where(y >= 0, y, neg_slope * y)
    o_ref[...] = y + cb_ref[...]


def _norm_add_res_kernel(x_ref, g_ref, b_ref, p_ref, r_ref, rg_ref, rb_ref,
                         o_ref, *, inv_n, eps, neg_slope, norm_res):
    x = x_ref[...]
    p = p_ref[...]
    mean, var = _norm_stats(x, p, inv_n)
    y = (x - mean) * (g_ref[...] * lax.rsqrt(var + eps)) + b_ref[...]
    r = r_ref[...]
    if norm_res:
        rmean, rvar = _norm_stats(r, p, inv_n)
        r = (r - rmean) * (rg_ref[...] * lax.rsqrt(rvar + eps)) + rb_ref[...]
    z = y + r
    o_ref[...] = jnp.where(z >= 0, z, neg_slope * z)


def instance_norm_act_bias(x, gamma, beta, chan_bias, eps=1e-5, neg_slope=0.01):
    """out = leaky_relu(instance_norm(x)) + chan_bias  (chan_bias per (B,C))."""
    x = x.astype(jnp.float32)
    B, D, H, W, C = x.shape
    S = D * H * W
    pack = _choose_pack(S, C)
    pc = pack * C
    s8 = S // pack
    xr = _pack_channels(x, pack)
    g = jnp.tile(gamma.astype(jnp.float32), pack).reshape(1, pc)
    b = jnp.tile(beta.astype(jnp.float32), pack).reshape(1, pc)
    cb = jnp.tile(chan_bias.astype(jnp.float32), (1, pack)).reshape(B, 1, pc)
    P = _group_matrix(C, pack)
    out = pl.pallas_call(
        partial(_norm_act_bias_kernel, inv_n=1.0 / S, eps=eps,
                neg_slope=neg_slope),
        out_shape=jax.ShapeDtypeStruct((B, s8, pc), jnp.float32),
        grid=(B,),
        in_specs=[pl.BlockSpec((None, s8, pc), lambda i: (i, 0, 0)),
                  pl.BlockSpec((1, pc), lambda i: (0, 0)),
                  pl.BlockSpec((1, pc), lambda i: (0, 0)),
                  pl.BlockSpec((pc, pc), lambda i: (0, 0)),
                  pl.BlockSpec((None, 1, pc), lambda i: (i, 0, 0))],
        out_specs=pl.BlockSpec((None, s8, pc), lambda i: (i, 0, 0)),
        compiler_params=pltpu.CompilerParams(
            dimension_semantics=("parallel",),
            vmem_limit_bytes=_NORM_VMEM_LIMIT),
    )(xr, g, b, P, cb)
    return out.reshape(B, D, H, W, C)


def instance_norm_add_res(x, gamma, beta, res, res_gamma=None, res_beta=None,
                          eps=1e-5, neg_slope=0.01):
    """out = leaky_relu(instance_norm(x) + maybe_instance_norm(res))."""
    x = x.astype(jnp.float32)
    res = res.astype(jnp.float32)
    B, D, H, W, C = x.shape
    S = D * H * W
    pack = _choose_pack(S, C)
    pc = pack * C
    s8 = S // pack
    norm_res = res_gamma is not None
    xr = _pack_channels(x, pack)
    rr = _pack_channels(res, pack)
    g = jnp.tile(gamma.astype(jnp.float32), pack).reshape(1, pc)
    b = jnp.tile(beta.astype(jnp.float32), pack).reshape(1, pc)
    if norm_res:
        rg = jnp.tile(res_gamma.astype(jnp.float32), pack).reshape(1, pc)
        rb = jnp.tile(res_beta.astype(jnp.float32), pack).reshape(1, pc)
    else:
        rg = jnp.ones((1, pc), jnp.float32)
        rb = jnp.zeros((1, pc), jnp.float32)
    P = _group_matrix(C, pack)
    out = pl.pallas_call(
        partial(_norm_add_res_kernel, inv_n=1.0 / S, eps=eps,
                neg_slope=neg_slope, norm_res=norm_res),
        out_shape=jax.ShapeDtypeStruct((B, s8, pc), jnp.float32),
        grid=(B,),
        in_specs=[pl.BlockSpec((None, s8, pc), lambda i: (i, 0, 0)),
                  pl.BlockSpec((1, pc), lambda i: (0, 0)),
                  pl.BlockSpec((1, pc), lambda i: (0, 0)),
                  pl.BlockSpec((pc, pc), lambda i: (0, 0)),
                  pl.BlockSpec((None, s8, pc), lambda i: (i, 0, 0)),
                  pl.BlockSpec((1, pc), lambda i: (0, 0)),
                  pl.BlockSpec((1, pc), lambda i: (0, 0))],
        out_specs=pl.BlockSpec((None, s8, pc), lambda i: (i, 0, 0)),
        compiler_params=pltpu.CompilerParams(
            dimension_semantics=("parallel",),
            vmem_limit_bytes=_NORM_VMEM_LIMIT),
    )(xr, g, b, P, rr, rg, rb)
    return out.reshape(B, D, H, W, C)


# ----------------------------------------------------------------------------
# Pallas kernel 4: fused  s = a + e ;  r = s * (1 - sigmoid(s))
# ----------------------------------------------------------------------------
def _add_rev_kernel(a_ref, e_ref, s_ref, r_ref):
    s = a_ref[...] + e_ref[...]
    s_ref[...] = s
    r_ref[...] = s * (1.0 - jax.nn.sigmoid(s))


def add_and_reverse_attention(a, e):
    """Returns (s, r) with s = a + e and r = s * (1 - sigmoid(s))."""
    a = a.astype(jnp.float32)
    e = e.astype(jnp.float32)
    shape = a.shape
    n = a.size
    if n % (8 * 128) != 0:
        s = a + e
        return s, s * (1.0 - jax.nn.sigmoid(s))
    rows = n // 128
    tr = rows
    for cand in (1024, 512, 256, 128, 64, 32, 16, 8):
        if rows % cand == 0:
            tr = cand
            break
    af = a.reshape(rows, 128)
    ef = e.reshape(rows, 128)
    s, r = pl.pallas_call(
        _add_rev_kernel,
        out_shape=(jax.ShapeDtypeStruct((rows, 128), jnp.float32),
                   jax.ShapeDtypeStruct((rows, 128), jnp.float32)),
        grid=(rows // tr,),
        in_specs=[pl.BlockSpec((tr, 128), lambda i: (i, 0)),
                  pl.BlockSpec((tr, 128), lambda i: (i, 0))],
        out_specs=(pl.BlockSpec((tr, 128), lambda i: (i, 0)),
                   pl.BlockSpec((tr, 128), lambda i: (i, 0))),
        compiler_params=pltpu.CompilerParams(
            dimension_semantics=("parallel",)),
    )(af, ef)
    return s.reshape(shape), r.reshape(shape)


# ----------------------------------------------------------------------------
# Conv / transposed-conv built on the Pallas matmul (im2col GEMM, bf16)
# ----------------------------------------------------------------------------
def _im2col(x, k, stride, pad):
    B, D, H, W, C = x.shape
    if pad:
        x = jnp.pad(x, ((0, 0), (pad, pad), (pad, pad), (pad, pad), (0, 0)))
    Do = (D + 2 * pad - k) // stride + 1
    Ho = (H + 2 * pad - k) // stride + 1
    Wo = (W + 2 * pad - k) // stride + 1
    cols = []
    for dz in range(k):
        for dy in range(k):
            for dx in range(k):
                cols.append(x[:, dz:dz + Do * stride:stride,
                              dy:dy + Ho * stride:stride,
                              dx:dx + Wo * stride:stride, :])
    return jnp.concatenate(cols, axis=-1), (B, Do, Ho, Wo)


def conv3d(x, w, b, stride=1, pad=1):
    """x: NDHWC, w: (k, k, k, Cin, Cout), b: (Cout,).  bf16 MXU GEMM."""
    k = w.shape[0]
    cout = w.shape[-1]
    x = x.astype(jnp.bfloat16)        # halves the im2col materialization
    w = w.astype(jnp.bfloat16)
    if k == 1 and stride == 1 and pad == 0:
        B, D, H, W, _ = x.shape
        cols, dims = x, (B, D, H, W)
    else:
        # TODO(synk): stream the k^3 taps as a K-grid axis inside the matmul
        # kernel (fused im2col) instead of materializing the cols tensor in HBM.
        cols, dims = _im2col(x, k, stride, pad)
    B, Do, Ho, Wo = dims
    out = matmul(cols.reshape(-1, cols.shape[-1]), w.reshape(-1, cout), b)
    return out.reshape(B, Do, Ho, Wo, cout)


def transp_conv2x(x, w, b):
    """Transposed conv, kernel 2, stride 2.  w: (Cin, 8*Cout), b: (Cout,)."""
    B, D, H, W, Cin = x.shape
    Cout = w.shape[1] // 8
    bias8 = jnp.tile(b, 8)            # bias per (2,2,2,Cout) output column
    y = matmul(x.reshape(-1, Cin), w, bias8).reshape(B, D, H, W, 2, 2, 2, Cout)
    # TODO(synk): scatter GEMM tiles directly into their upsampled positions
    # via a custom out_specs index_map instead of this HBM transpose.
    y = y.transpose(0, 1, 4, 2, 5, 3, 6, 7).reshape(B, 2 * D, 2 * H, 2 * W, Cout)
    return y


def layer_norm(x, g, b, eps=1e-5):
    mean = x.mean(-1, keepdims=True)
    var = jnp.square(x - mean).mean(-1, keepdims=True)
    return (x - mean) * lax.rsqrt(var + eps) * g + b


# ----------------------------------------------------------------------------
# Parameter factory (deterministic synthetic init)
# ----------------------------------------------------------------------------
class ParamFactory:
    def __init__(self, key):
        self._key = key

    def take(self):
        self._key, k = jax.random.split(self._key)
        return k

    def dense(self, din, dout, scale=0.02):
        return (scale * jax.random.normal(self.take(), (din, dout), jnp.float32),
                jnp.zeros((dout,), jnp.float32))

    def conv(self, k, cin, cout, scale=0.02):
        return (scale * jax.random.normal(self.take(), (k, k, k, cin, cout),
                                          jnp.float32),
                jnp.zeros((cout,), jnp.float32))

    def norm(self, c):
        return (jnp.ones((c,), jnp.float32), jnp.zeros((c,), jnp.float32))


def _basic_block_params(pf, cin, cout, emb_size):
    bp = {}
    bp['w1'], bp['b1'] = pf.conv(3, cin, cout)
    bp['n1'] = pf.norm(cout)
    bp['temb'] = pf.dense(emb_size, cout)
    bp['w2'], bp['b2'] = pf.conv(3, cout, cout)
    bp['n2'] = pf.norm(cout)
    if cin != cout:
        bp['wr'], bp['br'] = pf.conv(1, cin, cout)
        bp['nr'] = pf.norm(cout)
    return bp


def init_params(key, in_channels, out_channels, fs,
                emb_dim=128, emb_size=512, depths=(2, 2, 2, 2)):
    pf = ParamFactory(key)
    p = {}
    # TimeStepEmbedder: sinusoidal(emb_dim) -> Linear -> SiLU -> Linear
    p['t1'] = pf.dense(emb_dim, emb_size)
    p['t2'] = pf.dense(emb_size, emb_size)

    swin = {}
    swin['pe_w'] = 0.02 * jax.random.normal(pf.take(), (8 * in_channels, fs),
                                            jnp.float32)
    swin['pe_b'] = jnp.zeros((fs,), jnp.float32)
    chans = [fs, 2 * fs, 4 * fs, 8 * fs, 16 * fs]
    swin['pnorm'] = [pf.norm(c) for c in chans]
    stages = []
    c = fs
    for s in range(4):
        sp = {'temb': pf.dense(emb_size, c)}
        blocks = []
        for _ in range(depths[s]):
            blocks.append({'ln': pf.norm(c),
                           'fc1': pf.dense(c, 4 * c),
                           'fc2': pf.dense(4 * c, c)})
        sp['blocks'] = blocks
        sp['mnorm'] = pf.norm(8 * c)
        sp['mred_w'] = 0.02 * jax.random.normal(pf.take(), (8 * c, 2 * c),
                                                jnp.float32)
        stages.append(sp)
        c *= 2
    swin['stages'] = stages
    p['swin'] = swin

    p['encoder1'] = _basic_block_params(pf, in_channels, fs, emb_size)
    p['encoder2'] = _basic_block_params(pf, fs, fs, emb_size)
    p['encoder3'] = _basic_block_params(pf, 2 * fs, 2 * fs, emb_size)
    p['encoder4'] = _basic_block_params(pf, 4 * fs, 4 * fs, emb_size)
    p['encoder10'] = _basic_block_params(pf, 16 * fs, 16 * fs, emb_size)

    def up(cin, cout):
        return {'wt': 0.02 * jax.random.normal(pf.take(), (cin, 8 * cout),
                                               jnp.float32),
                'bt': jnp.zeros((cout,), jnp.float32),
                'res': _basic_block_params(pf, 2 * cout, cout, emb_size)}

    p['decoder5'] = up(16 * fs, 8 * fs)
    p['decoder4'] = up(8 * fs, 4 * fs)
    p['decoder3'] = up(4 * fs, 2 * fs)
    p['decoder2'] = up(2 * fs, fs)
    p['decoder1'] = up(fs, fs)
    p['out_w'], p['out_b'] = pf.conv(1, fs, out_channels)
    return p


# ----------------------------------------------------------------------------
# Model blocks
# ----------------------------------------------------------------------------
def timestep_embedding(t, dim):
    half = dim // 2
    freqs = jnp.exp(-math.log(10000.0) *
                    jnp.arange(half, dtype=jnp.float32) / half)
    args = t.astype(jnp.float32)[:, None] * freqs[None, :]
    return jnp.concatenate([jnp.cos(args), jnp.sin(args)], axis=-1)


def basic_block(p, x, temb):
    """UnetrBasicBlock (res_block=True) with time-embedding conditioning.

    conv -> fused[IN + LeakyReLU + temb add] -> conv
         -> fused[IN + (optionally IN'd) residual add + LeakyReLU]."""
    te = linear(jax.nn.silu(temb), *p['temb'])               # (B, Cout)
    h = conv3d(x, p['w1'], p['b1'], stride=1, pad=1)
    h = instance_norm_act_bias(h, p['n1'][0], p['n1'][1], te)
    h = conv3d(h, p['w2'], p['b2'], stride=1, pad=1)
    if 'wr' in p:
        r = conv3d(x, p['wr'], p['br'], stride=1, pad=0)
        out = instance_norm_add_res(h, p['n2'][0], p['n2'][1], r,
                                    p['nr'][0], p['nr'][1])
    else:
        out = instance_norm_add_res(h, p['n2'][0], p['n2'][1], x)
    return out


def up_block(p, x, skip, temb):
    """UnetrUpBlock: transp-conv x2 upsample, concat skip, residual block."""
    up = transp_conv2x(x, p['wt'], p['bt'])
    cat = jnp.concatenate([up, skip], axis=-1)
    return basic_block(p['res'], cat, temb)


def swin_vit(p, x, temb, fs, depths=(2, 2, 2, 2)):
    """Simplified SwinTransformer encoder producing 5 hidden states."""
    cols, (B, Do, Ho, Wo) = _im2col(x.astype(jnp.bfloat16), 2, 2, 0)
    x0 = matmul(cols.reshape(-1, cols.shape[-1]), p['pe_w'],
                p['pe_b']).reshape(B, Do, Ho, Wo, fs)
    hidden = [layer_norm(x0, *p['pnorm'][0])]
    cur = x0
    c = fs
    for s in range(4):
        sp = p['stages'][s]
        cur = cur + linear(jax.nn.silu(temb), *sp['temb'])[:, None, None, None, :]
        # TODO(synk): SwinTransformerBlock windowed self-attention (relative
        # position bias / cyclic shift) is not implemented; each block is
        # approximated by a per-token LayerNorm + MLP residual.
        for blk in sp['blocks'][:depths[s]]:
            Cc = cur.shape[-1]
            tok = layer_norm(cur.reshape(-1, Cc), *blk['ln'])
            h = linear(tok, *blk['fc1'], act="gelu")
            h = linear(h, *blk['fc2'])
            cur = cur + h.reshape(cur.shape)
        # Patch merging: 2x2x2 neighbor concat -> LayerNorm -> Linear(8C, 2C)
        mcols, (Bm, Dm, Hm, Wm) = _im2col(cur, 2, 2, 0)
        m = layer_norm(mcols, *sp['mnorm'])
        cur = matmul(m.reshape(-1, m.shape[-1]),
                     sp['mred_w']).reshape(Bm, Dm, Hm, Wm, 2 * c)
        c *= 2
        hidden.append(layer_norm(cur, *p['pnorm'][s + 1]))
    return hidden


def forward(params, x, t, image, embeddings, fs=12, emb_dim=128):
    """Mirrors SwinUNETRDenoiser.forward.  x/image/embeddings in NCDHW."""
    def to_ndhwc(a):
        return jnp.transpose(a, (0, 2, 3, 4, 1))

    def to_ncdhw(a):
        return jnp.transpose(a, (0, 4, 1, 2, 3))

    # t = self.t_embedder(t)
    temb = timestep_embedding(t, emb_dim)
    temb = linear(temb, *params['t1'])
    temb = jax.nn.silu(temb)
    temb = linear(temb, *params['t2'])

    # x = torch.cat([image, x], dim=1)
    xin = jnp.concatenate([to_ndhwc(image), to_ndhwc(x)], axis=-1)

    hidden = swin_vit(params['swin'], xin, temb, fs)
    hidden = [h + to_ndhwc(e) for h, e in zip(hidden, embeddings[0])]

    enc0, r0 = add_and_reverse_attention(
        basic_block(params['encoder1'], xin, temb), to_ndhwc(embeddings[1]))
    enc1, r1 = add_and_reverse_attention(
        basic_block(params['encoder2'], hidden[0], temb), to_ndhwc(embeddings[2]))
    enc2, r2 = add_and_reverse_attention(
        basic_block(params['encoder3'], hidden[1], temb), to_ndhwc(embeddings[3]))
    enc3, r3 = add_and_reverse_attention(
        basic_block(params['encoder4'], hidden[2], temb), to_ndhwc(embeddings[4]))

    dec4 = basic_block(params['encoder10'], hidden[4], temb)
    dec3 = up_block(params['decoder5'], dec4, hidden[3], temb)
    dec2 = up_block(params['decoder4'], dec3, enc3, temb) + r3
    dec1 = up_block(params['decoder3'], dec2, enc2, temb) + r2
    dec0 = up_block(params['decoder2'], dec1, enc1, temb) + r1
    out = up_block(params['decoder1'], dec0, enc0, temb) + r0

    logits = conv3d(out, params['out_w'], params['out_b'], stride=1, pad=0)
    return to_ncdhw(logits)


# ----------------------------------------------------------------------------
if __name__ == "__main__":
    key = jax.random.PRNGKey(0)
    B = 1
    S = 32                      # must be divisible by 2**5
    fs = 12                     # feature_size (divisible by 12)
    img_c, x_c = 1, 1
    in_channels = img_c + x_c   # swinViT input channels (image concat x)
    out_channels = 1

    k1, k2, kp, *ke = jax.random.split(key, 16)
    x = jax.random.normal(k1, (B, x_c, S, S, S), jnp.float32)
    image = jax.random.normal(k2, (B, img_c, S, S, S), jnp.float32)
    t = jnp.array([3.0], jnp.float32)

    # embeddings = ([5 x hidden-state embeddings], e1, e2, e3, e4), all NCDHW
    chans = [fs, 2 * fs, 4 * fs, 8 * fs, 16 * fs]
    res = [S // 2, S // 4, S // 8, S // 16, S // 32]
    hid_embs = [0.1 * jax.random.normal(ke[i], (B, chans[i], res[i], res[i], res[i]),
                                        jnp.float32) for i in range(5)]
    e1 = 0.1 * jax.random.normal(ke[5], (B, fs, S, S, S), jnp.float32)
    e2 = 0.1 * jax.random.normal(ke[6], (B, fs, S // 2, S // 2, S // 2), jnp.float32)
    e3 = 0.1 * jax.random.normal(ke[7], (B, 2 * fs, S // 4, S // 4, S // 4), jnp.float32)
    e4 = 0.1 * jax.random.normal(ke[8], (B, 4 * fs, S // 8, S // 8, S // 8), jnp.float32)
    embeddings = (hid_embs, e1, e2, e3, e4)

    params = init_params(kp, in_channels, out_channels, fs)

    logits = forward(params, x, t, image, embeddings, fs=fs, emb_dim=128)
    jax.block_until_ready(logits)
    assert logits.shape == (B, out_channels, S, S, S), logits.shape
    assert bool(jnp.all(jnp.isfinite(logits)))
    print("KERNEL_OK")
</pallas_src>

<mosaic_0001>
module attributes {stable_mosaic.version = 11 : i64} {
  func.func @_matmul_kernel(%arg0: i32, %arg1: memref<8x128xbf16, #tpu.memory_space<vmem>>, %arg2: memref<128x512xbf16, #tpu.memory_space<vmem>>, %arg3: memref<1x512xf32, #tpu.memory_space<vmem>>, %arg4: memref<8x512xf32, #tpu.memory_space<vmem>>) attributes {dimension_semantics = [#tpu.dimension_semantics<parallel>], iteration_bounds = array<i64: 1>, scalar_prefetch = 0 : i64, scratch_operands = 0 : i64, tpu.core_type = #tpu.core_type<tc>, window_params = [{transform_indices = @transform_0, window_bounds = array<i64: 8, 128>}, {pipeline_mode = #tpu.pipeline_mode<synchronous>, transform_indices = @transform_1, window_bounds = array<i64: 128, 512>}, {pipeline_mode = #tpu.pipeline_mode<synchronous>, transform_indices = @transform_2, window_bounds = array<i64: 1, 512>}, {transform_indices = @transform_3, window_bounds = array<i64: 8, 512>}]} {
    %c0 = arith.constant 0 : index
    %c0_0 = arith.constant 0 : index
    %0 = vector.load %arg1[%c0, %c0_0] : memref<8x128xbf16, #tpu.memory_space<vmem>>, vector<8x128xbf16>
    %c0_1 = arith.constant 0 : index
    %c0_2 = arith.constant 0 : index
    %1 = vector.load %arg2[%c0_1, %c0_2] : memref<128x512xbf16, #tpu.memory_space<vmem>>, vector<128x512xbf16>
    %cst = arith.constant dense<0.000000e+00> : vector<8x512xf32>
    %2 = tpu.matmul %0, %1, %cst {dimension_numbers = #tpu.dot_dimension_numbers<[1], [0], [0], [1], [0, 0, 1, 1], [], []>} : vector<8x128xbf16>, vector<128x512xbf16>, vector<8x512xf32> -> vector<8x512xf32>
    %c0_3 = arith.constant 0 : index
    %c0_4 = arith.constant 0 : index
    %3 = vector.load %arg3[%c0_3, %c0_4] : memref<1x512xf32, #tpu.memory_space<vmem>>, vector<1x512xf32>
    %4 = vector.broadcast %3 : vector<1x512xf32> to vector<8x512xf32>
    %5 = arith.addf %2, %4 : vector<8x512xf32>
    %c0_5 = arith.constant 0 : index
    %c0_6 = arith.constant 0 : index
    %6 = vector.load %arg4[%c0_5, %c0_6] : memref<8x512xf32, #tpu.memory_space<vmem>>, vector<8x512xf32>
    tpu.vector_store %arg4[%c0_5, %c0_6], %5 {strides = array<i32>} : memref<8x512xf32, #tpu.memory_space<vmem>>, vector<8x512xf32>,
    return
  }
  func.func @transform_0(%arg0: i32) -> (i32, i32) {
    %c0_i32 = arith.constant 0 : i32
    %c0_i32_0 = arith.constant 0 : i32
    return %arg0, %c0_i32 : i32, i32
  }
  func.func @transform_1(%arg0: i32) -> (i32, i32) {
    %c0_i32 = arith.constant 0 : i32
    %c0_i32_0 = arith.constant 0 : i32
    %c0_i32_1 = arith.constant 0 : i32
    return %c0_i32, %c0_i32_0 : i32, i32
  }
  func.func @transform_2(%arg0: i32) -> (i32, i32) {
    %c0_i32 = arith.constant 0 : i32
    %c0_i32_0 = arith.constant 0 : i32
    %c0_i32_1 = arith.constant 0 : i32
    return %c0_i32, %c0_i32_0 : i32, i32
  }
  func.func @transform_3(%arg0: i32) -> (i32, i32) {
    %c0_i32 = arith.constant 0 : i32
    %c0_i32_0 = arith.constant 0 : i32
    return %arg0, %c0_i32 : i32, i32
  }
}

</mosaic_0001>

<bundles_post_ra>
// kernel: tpu_custom_call.1
= control target key start
LH: loop header
LB: loop body
LE: loop exit
PB: predicated region body
PF: predicated region fallthrough
CT: control target
= control target key end

     0   :  { %8 = vsyncpa [#allocation3], 0  ;;  %s589_s0 = inlined_call_operand.hbm [shape: bf16[8,128], index: 0, kind: input, shape index: {}]   ;;  %s590_s1 = inlined_call_operand.hbm [shape: bf16[128,512], index: 1, kind: input, shape index: {}]   ;;  %s591_s2 = inlined_call_operand.vmem [shape: f32[1,512], index: 2, kind: input, shape index: {}]   ;;  %s592_s3 = inlined_call_operand.hbm [shape: f32[8,512], index: 3, kind: output, shape index: {}]  }
   0x1   :  { %9 = vsyncpa [#allocation6], 0 }
   0x2   :  { %10 = vsyncpa [#allocation4], 0  ;;  %s517_s12 = smov [#allocation2]   ;;  %s518_s14 = smov [#allocation5]  }
   0x3   :  { %s17_s13 = sshll.u32 %s517_s12, 4  ;;  %s26_s15 = sshll.u32 %s518_s14, 4  ;;  %s18_s13 = int_to_ptr.vmem [resolvable:$true] %s17_s13  ;;  %s543_s15 = int_to_ptr.vmem [resolvable:$true] %s26_s15 }
   0x4   :  { %s445_s18 = scalar_lea.hbm %s589_s0, 64 }
   0x5   :  { %p446_p0 = scmp.ne.s32.totalorder %s589_s0, %s445_s18  ;;  %p449_p1 = scmp.lt.u32.totalorder %s445_s18, %s589_s0 }
   0x7   :  { %p451_p2 = pnand %p449_p1, %p446_p0 }
   0x9   :  { %454 = shalt.err (!%p451_p2)
}
   0xa   :  { %s455_s23 = scalar_lea.vmem %s18_s13, 64  ;;  %p460_p4 = scmp.lt.s32.totalorder %s18_s13, %s18_s13 }
   0xb   :  { %p456_p3 = scmp.ne.s32.totalorder %s18_s13, %s455_s23  ;;  %p461_p5 = scmp.lt.s32.totalorder %s455_s23, %s455_s23 }
   0xd   :  { %p462_p6 = por %p461_p5, %p460_p4 }
   0xf   :  { %p463_p7 = pnand %p462_p6, %p456_p3 }
  0x11   :  { %466 = shalt.err (!%p463_p7)
}
  0x12   :  { %20 = dma.hbm_to_vmem [thread:$0]  %s589_s0, 64, %s18_s13, [#allocation3]  }
  0x13   :  { %s467_s28 = scalar_lea.hbm %s590_s1, 4096 }
  0x14   :  { %p468_p8 = scmp.ne.s32.totalorder %s590_s1, %s467_s28  ;;  %p471_p9 = scmp.lt.u32.totalorder %s467_s28, %s590_s1 }
  0x16   :  { %p473_p10 = pnand %p471_p9, %p468_p8 }
  0x18   :  { %476 = shalt.err (!%p473_p10)
}
  0x19   :  { %s477_s6 = scalar_lea.vmem %s543_s15, 4096  ;;  %p482_p12 = scmp.lt.s32.totalorder %s543_s15, %s543_s15 }
  0x1a   :  { %p478_p11 = scmp.ne.s32.totalorder %s543_s15, %s477_s6  ;;  %p483_p13 = scmp.lt.s32.totalorder %s477_s6, %s477_s6 }
  0x1c   :  { %p484_p0 = por %p483_p13, %p482_p12 }
  0x1e   :  { %p485_p1 = pnand %p484_p0, %p478_p11 }
  0x20   :  { %488 = shalt.err (!%p485_p1)
}
  0x21   :  { %s519_s0 = smov 256   ;;  %s520_s7 = smov 16  }
  0x22   :  { %32 = dma.hbm_to_vmem [thread:$0]  %s590_s1, 4096, %s543_s15, [#allocation6], %s519_s0, %s519_s0, %s520_s7  }
  0x23   :  { %511 = dma.done.wait [#allocation3], 64  }
  0x24   :  { %512 = vsyncadd [#allocation3], 4294967232 }
  0x25   :  { %513 = dma.done.wait [#allocation6], 4096  }
  0x26   :  { %514 = vsyncadd [#allocation6], 4294963200  ;;  %v521_v0 = vmov 0   ;;  %v397_v1 = vld [vmem:[#allocation5 + $0x4] ss:$16 sps:$4 sm:$0xff]   ;;  %v77_v34 = vlaneseq  ;;  %s522_s11 = smov [#allocation7]  }
  0x27   :  { %289 = vmatprep.mubr.bf16.mxu0 %v521_v0  ;;  %330 = vmatprep.mubr.bf16.mxu1 %v521_v0  ;;  %v399_v2 = vld [vmem:[#allocation5 + $0xc] ss:$16 sps:$4 sm:$0xff]   ;;  %v401_v3 = vld [vmem:[#allocation5] ss:$16 sps:$4 sm:$0xff]   ;;  %v402_v4 = vld [vmem:[#allocation5 + $0x8] ss:$16 sps:$4 sm:$0xff]  }
  0x28   :  { %257 = vmatprep.subr.bf16.mxu0 %v397_v1  ;;  %298 = vmatprep.subr.bf16.mxu1 %v399_v2  ;;  %v403_v5 = vld [vmem:[#allocation5 + $0x24] ss:$16 sps:$4 sm:$0xff]   ;;  %v405_v6 = vld [vmem:[#allocation5 + $0x2c] ss:$16 sps:$4 sm:$0xff]   ;;  %v407_v7 = vld [vmem:[#allocation5 + $0x20] ss:$16 sps:$4 sm:$0xff]  }
  0x29   :  { %258 = vmatpush1.bf16.msra.mxu0 %v401_v3  ;;  %299 = vmatpush1.bf16.msra.mxu1 %v402_v4  ;;  %v408_v8 = vld [vmem:[#allocation5 + $0x28] ss:$16 sps:$4 sm:$0xff]   ;;  %v409_v9 = vld [vmem:[#allocation5 + $0x44] ss:$16 sps:$4 sm:$0xff]   ;;  %v411_v10 = vld [vmem:[#allocation5 + $0x4c] ss:$16 sps:$4 sm:$0xff]  }
  0x2a   :  { %259 = vmatprep.subr.bf16.mxu0 %v403_v5  ;;  %300 = vmatprep.subr.bf16.mxu1 %v405_v6  ;;  %v413_v11 = vld [vmem:[#allocation5 + $0x40] ss:$16 sps:$4 sm:$0xff]   ;;  %v414_v12 = vld [vmem:[#allocation5 + $0x48] ss:$16 sps:$4 sm:$0xff]   ;;  %v415_v13 = vld [vmem:[#allocation5 + $0x64] ss:$16 sps:$4 sm:$0xff]  }
  0x2b   :  { %v417_v14 = vld [vmem:[#allocation5 + $0x6c] ss:$16 sps:$4 sm:$0xff]   ;;  %v419_v15 = vld [vmem:[#allocation5 + $0x60] ss:$16 sps:$4 sm:$0xff]   ;;  %v420_v16 = vld [vmem:[#allocation5 + $0x68] ss:$16 sps:$4 sm:$0xff]  }
  0x2c   :  { %v421_v17 = vld [vmem:[#allocation5 + $0x84] ss:$16 sps:$4 sm:$0xff]   ;;  %v423_v18 = vld [vmem:[#allocation5 + $0x8c] ss:$16 sps:$4 sm:$0xff]   ;;  %v425_v19 = vld [vmem:[#allocation5 + $0x80] ss:$16 sps:$4 sm:$0xff]  }
  0x2d   :  { %260 = vmatpush1.bf16.msra.mxu0 %v407_v7  ;;  %301 = vmatpush1.bf16.msra.mxu1 %v408_v8  ;;  %v426_v20 = vld [vmem:[#allocation5 + $0x88] ss:$16 sps:$4 sm:$0xff]   ;;  %v427_v21 = vld [vmem:[#allocation5 + $0xa4] ss:$16 sps:$4 sm:$0xff]   ;;  %v429_v22 = vld [vmem:[#allocation5 + $0xac] ss:$16 sps:$4 sm:$0xff]  }
  0x2e   :  { %261 = vmatprep.subr.bf16.mxu0 %v409_v9  ;;  %302 = vmatprep.subr.bf16.mxu1 %v411_v10  ;;  %v431_v23 = vld [vmem:[#allocation5 + $0xa0] ss:$16 sps:$4 sm:$0xff]   ;;  %v432_v24 = vld [vmem:[#allocation5 + $0xa8] ss:$16 sps:$4 sm:$0xff]   ;;  %v433_v25 = vld [vmem:[#allocation5 + $0xc4] ss:$16 sps:$4 sm:$0xff]  }
  0x2f   :  { %v435_v26 = vld [vmem:[#allocation5 + $0xcc] ss:$16 sps:$4 sm:$0xff]   ;;  %v437_v27 = vld [vmem:[#allocation5 + $0xc0] ss:$16 sps:$4 sm:$0xff]   ;;  %v438_v28 = vld [vmem:[#allocation5 + $0xc8] ss:$16 sps:$4 sm:$0xff]  }
  0x30   :  { %v439_v29 = vld [vmem:[#allocation5 + $0xe4] ss:$16 sps:$4 sm:$0xff]   ;;  %v441_v30 = vld [vmem:[#allocation5 + $0xec] ss:$16 sps:$4 sm:$0xff]   ;;  %v443_v31 = vld [vmem:[#allocation5 + $0xe0] ss:$16 sps:$4 sm:$0xff]  }
  0x31   :  { %262 = vmatpush1.bf16.msra.mxu0 %v413_v11  ;;  %303 = vmatpush1.bf16.msra.mxu1 %v414_v12  ;;  %v444_v32 = vld [vmem:[#allocation5 + $0xe8] ss:$16 sps:$4 sm:$0xff]   ;;  %v42_v33 = vld [vmem:[#allocation2] sm:$0xf]  ;;  %v78_v35 = vshrl.u32 %v77_v34, 7  ;;  %s349_s12 = sshll.u32 %s522_s11, 4  ;;  %s350_s12 = int_to_ptr.vmem [resolvable:$true] %s349_s12 }
  0x32   :  { %263 = vmatprep.subr.bf16.mxu0 %v415_v13  ;;  %304 = vmatprep.subr.bf16.mxu1 %v417_v14  ;;  %v75_v38 = vld [vmem:[%s591_s2] sm:$0xf]  ;;  %s489_s2 = scalar_lea.vmem %s350_s12, 512  ;;  %p494_p3 = scmp.lt.s32.totalorder %s350_s12, %s350_s12 }
  0x33   :  { %v79_v36 = vsub.s32 0, %v78_v35  ;;  %v87_v37 = vsub.s32 2, %v78_v35  ;;  %v83_v39 = vsub.s32 1, %v78_v35  ;;  %v91_v40 = vsub.s32 3, %v78_v35  ;;  %p490_p2 = scmp.ne.s32.totalorder %s350_s12, %s489_s2  ;;  %p495_p4 = scmp.lt.s32.totalorder %s489_s2, %s489_s2 }
  0x35   :  { %264 = vmatpush1.bf16.msra.mxu0 %v419_v15  ;;  %305 = vmatpush1.bf16.msra.mxu1 %v420_v16  ;;  %v80_v41 = vrot.slane %v75_v38, %v79_v36  ;;  %v88_v42 = vrot.slane %v75_v38, %v87_v37  ;;  %v84_v43 = vrot.slane %v75_v38, %v83_v39  ;;  %p496_p5 = por %p495_p4, %p494_p3 }
  0x36   :  { %265 = vmatprep.subr.bf16.mxu0 %v421_v17  ;;  %306 = vmatprep.subr.bf16.mxu1 %v423_v18  ;;  %v92_v44 = vrot.slane %v75_v38, %v91_v40 }
  0x37   :  { %p497_p6 = pnand %p496_p5, %p490_p2 }
  0x39   :  { %266 = vmatpush1.bf16.msra.mxu0 %v425_v19  ;;  %307 = vmatpush1.bf16.msra.mxu1 %v426_v20 }
  0x3a   :  { %267 = vmatprep.subr.bf16.mxu0 %v427_v21  ;;  %308 = vmatprep.subr.bf16.mxu1 %v429_v22 }
  0x3d   :  { %268 = vmatpush1.bf16.msra.mxu0 %v431_v23  ;;  %309 = vmatpush1.bf16.msra.mxu1 %v432_v24 }
  0x3e   :  { %269 = vmatprep.subr.bf16.mxu0 %v433_v25  ;;  %310 = vmatprep.subr.bf16.mxu1 %v435_v26 }
  0x41   :  { %270 = vmatpush1.bf16.msra.mxu0 %v437_v27  ;;  %311 = vmatpush1.bf16.msra.mxu1 %v438_v28 }
  0x42   :  { %271 = vmatprep.subr.bf16.mxu0 %v439_v29  ;;  %312 = vmatprep.subr.bf16.mxu1 %v441_v30 }
  0x45   :  { %272 = vmatpush1.bf16.msra.mxu0 %v443_v31  ;;  %313 = vmatpush1.bf16.msra.mxu1 %v444_v32 }
  0x48   :  { %290 = vmatmul.mubr.bf16.vlgmr.msra.gmra.mrb[0].mxu0 %v42_v33  ;;  %331 = vmatmul.mubr.bf16.vlgmr.msra.gmra.mrb[0].mxu1 %v42_v33 }
 0x11b   :  { %v291_v45 = vpop.f32.mrb[0].mxu0  ;;  %v332_v46 = vpop.f32.mrb[0].mxu1 }
 0x11c   :  { %v292_v47 = vadd.f32 %v291_v45, %v80_v41  ;;  %v333_v48 = vadd.f32 %v332_v46, %v88_v42  ;;  %v293_v49 = vpop.f32.mrb[1].mxu0  ;;  %v334_v50 = vpop.f32.mrb[1].mxu1 }
 0x11d   :  { %v294_v51 = vadd.f32 %v293_v49, %v84_v43  ;;  %v335_v52 = vadd.f32 %v334_v50, %v92_v44  ;;  %v295_v53 = vpop.f32.mrb[2].mxu0  ;;  %v336_v54 = vpop.f32.mrb[2].mxu1 }
 0x11e   :  { %339 = vst [vmem:[#allocation7] sm:$0xff] %v292_v47  ;;  %341 = vst [vmem:[#allocation7 + $0x10] sm:$0xff] %v333_v48  ;;  %v296_v55 = vpop.f32.mrb[3].mxu0  ;;  %v337_v56 = vpop.f32.mrb[3].mxu1 }
 0x11f   :  { %340 = vst [vmem:[#allocation7 + $0x8] sm:$0xff] %v294_v51  ;;  %342 = vst [vmem:[#allocation7 + $0x18] sm:$0xff] %v335_v52 }
 0x120   :  { %500 = shalt.err (!%p497_p6)
}
 0x121   :  { %s501_s15 = scalar_lea.hbm %s592_s3, 512 }
 0x122   :  { %p502_p7 = scmp.ne.s32.totalorder %s592_s3, %s501_s15  ;;  %p505_p8 = scmp.lt.u32.totalorder %s501_s15, %s592_s3 }
 0x124   :  { %p507_p9 = pnand %p505_p8, %p502_p7 }
 0x126   :  { %510 = shalt.err (!%p507_p9)
}
 0x127   :  { %352 = dma.vmem_to_hbm [thread:$0]  %s350_s12, 512, %s592_s3, [#allocation4]  }
 0x128   :  { %515 = dma.done.wait [#allocation4], 512  }
 0x129   :  { %516 = vsyncadd [#allocation4], 4294966784 }
 0x12a   :  { %356 = vsyncpa [#allocation3], 1 }
 0x12b   :  { %357 = vsyncpa [#allocation6], 1 }
 0x12c   :  { %358 = vsyncpa [#allocation4], 1 }

</bundles_post_ra>
